<compile_context>
chip_gen: v7x
topology: tpu7x:2x2x1
jax: 0.10.0
libtpu: 0.0.40
codegen_flags: <defaults>
</compile_context>

<pallas_src>
import functools
import math

import jax
import jax.numpy as jnp
from jax.experimental import pallas as pl
from jax.experimental.pallas import tpu as pltpu


def _pick_q_block(lq: int) -> int:
    """Largest query tile <= 256 that divides Lq and respects the (8,128) layout rule."""
    for cand in (256, 128, 64, 32, 16, 8):
        if lq % cand == 0:
            return cand
    return lq  # ragged / tiny Lq: single whole-sequence block


def _mha_kernel(q_ref, k_ref, v_ref, wq_ref, wk_ref, wv_ref, wo_ref, o_ref,
                kh_s, vh_s, *, num_heads, d_k, d_v, q_block, causal_mask,
                matmul_dtype, approx_recip):
    mm = matmul_dtype
    H = num_heads
    inv_sqrt_dk = jnp.float32(1.0 / math.sqrt(d_k))
    qt = pl.program_id(1)

    # ---- K/V projections: computed once per batch, cached in VMEM scratch. ----
    # Fused lane-dense (Lk, D) @ (D, H*d_k) MXU matmuls; per-head views are stored
    # head-batched (H, Lk, d) in matmul dtype so the attention matmuls read them
    # directly with no per-head casts.
    @pl.when(qt == 0)
    def _project_kv():
        k = k_ref[...].astype(mm)                                   # (Lk, D)
        v = v_ref[...].astype(mm)                                   # (Lk, D)
        kf = jnp.dot(k, wk_ref[...], preferred_element_type=jnp.float32)  # (Lk, H*d_k)
        vf = jnp.dot(v, wv_ref[...], preferred_element_type=jnp.float32)  # (Lk, H*d_v)
        kh_s[...] = jnp.stack(
            [kf[:, h * d_k:(h + 1) * d_k] for h in range(H)], axis=0).astype(mm)
        vh_s[...] = jnp.stack(
            [vf[:, h * d_v:(h + 1) * d_v] for h in range(H)], axis=0).astype(mm)

    # ---- Q projection for this query tile (fused, lane-dense), pre-scaled. ----
    q = q_ref[...].astype(mm)                                       # (TQ, D)
    qf = jnp.dot(q, wq_ref[...], preferred_element_type=jnp.float32) * inv_sqrt_dk
    qh = jnp.stack(
        [qf[:, h * d_k:(h + 1) * d_k] for h in range(H)], axis=0).astype(mm)  # (H,TQ,dk)

    # ---- Head-batched attention (scores + softmax + PV), f32 accumulation. ----
    s = jnp.einsum('hqd,hkd->hqk', qh, kh_s[...],
                   preferred_element_type=jnp.float32)              # (H, TQ, Lk)

    if causal_mask:
        tq, lk = s.shape[-2], s.shape[-1]
        # Mask built once for all heads; row index offset by the query-tile start.
        row = jax.lax.broadcasted_iota(jnp.int32, (tq, lk), 0) + qt * q_block
        col = jax.lax.broadcasted_iota(jnp.int32, (tq, lk), 1)
        s = jnp.where((col <= row)[None, :, :], s, jnp.float32(-1e9))

    # Un-normalized softmax; fold the denominator in AFTER the PV matmul so the
    # only divide-like op is an (H, TQ, 1) reciprocal, not (H, TQ, Lk) divides.
    m = jnp.max(s, axis=-1, keepdims=True)
    p = jnp.exp(s - m)                                              # (H, TQ, Lk) f32
    l = jnp.sum(p, axis=-1, keepdims=True)                          # (H, TQ, 1)  f32

    oh = jnp.einsum('hqk,hkv->hqv', p.astype(mm), vh_s[...],
                    preferred_element_type=jnp.float32)             # (H, TQ, d_v)
    oh = oh * pl.reciprocal(l, approx=approx_recip)

    # Lane-dense (TQ, H*d_v) value straight into the wide output projection
    # (no scratch round-trip / masked partial stores).
    oh_f = jnp.concatenate([oh[h] for h in range(H)], axis=-1)      # (TQ, H*d_v)
    o_ref[...] = jnp.dot(oh_f.astype(mm), wo_ref[...],
                         preferred_element_type=jnp.float32).astype(o_ref.dtype)


def multi_head_attention(Q, K, V, Wq, Wk, Wv, Wo, *, num_heads, d_k, d_v,
                         mask=False, matmul_dtype=jnp.bfloat16, q_block_size=None):
    """Q,K,V: (B, len, d_model).
    Wq/Wk: (d_model, H*d_k), Wv: (d_model, H*d_v), Wo: (H*d_v, d_model)
    (nn.Linear weights already transposed + concatenated head-major).
    matmul_dtype: MXU operand dtype (bf16 default; accumulation/softmax stay f32).
    Returns (B, len_q, d_model) in Q.dtype."""
    B, Lq, D = Q.shape
    _, Lk, _ = K.shape
    assert K.shape[1] == V.shape[1], "len_k and len_v must be equal"
    assert Wq.shape == (D, num_heads * d_k)
    assert Wk.shape == (D, num_heads * d_k)
    assert Wv.shape == (D, num_heads * d_v)
    assert Wo.shape == (num_heads * d_v, D)

    TQ = q_block_size if q_block_size is not None else _pick_q_block(Lq)
    assert Lq % TQ == 0, "q_block_size must divide len_q"
    n_qt = Lq // TQ

    # Cast weights at the wrapper on the reduced-precision path: halves the
    # resident weight footprint and removes in-kernel weight cast passes.
    Wq_c = Wq.astype(matmul_dtype)
    Wk_c = Wk.astype(matmul_dtype)
    Wv_c = Wv.astype(matmul_dtype)
    Wo_c = Wo.astype(matmul_dtype)

    kernel = functools.partial(
        _mha_kernel, num_heads=num_heads, d_k=d_k, d_v=d_v, q_block=TQ,
        causal_mask=mask, matmul_dtype=matmul_dtype,
        # approx reciprocal only on the reduced-precision path so the f32 path
        # keeps the strict 1e-4 tolerance vs. the reference.
        approx_recip=(matmul_dtype != jnp.float32))

    # Explicit scoped-VMEM budget: weights + scratch + double-buffered activation
    # blocks + f32 intermediates, with headroom (clamped to sane device limits).
    itemsize_act = Q.dtype.itemsize
    itemsize_mm = jnp.dtype(matmul_dtype).itemsize
    weight_bytes = 2 * itemsize_mm * (Wq_c.size + Wk_c.size + Wv_c.size + Wo_c.size)
    act_bytes = 2 * itemsize_act * (2 * TQ * D + 2 * Lk * D)
    scratch_bytes = itemsize_mm * num_heads * Lk * (d_k + d_v)
    interm_bytes = 4 * (4 * num_heads * TQ * Lk
                        + 2 * TQ * num_heads * (d_k + d_v) + 2 * TQ * D)
    vmem_limit = int(1.5 * (weight_bytes + act_bytes + scratch_bytes + interm_bytes))
    vmem_limit = min(max(vmem_limit, 32 * 1024 * 1024), 100 * 1024 * 1024)

    return pl.pallas_call(
        kernel,
        out_shape=jax.ShapeDtypeStruct((B, Lq, D), Q.dtype),
        grid_spec=pltpu.PrefetchScalarGridSpec(
            num_scalar_prefetch=0,
            grid=(B, n_qt),
            in_specs=[
                # Query tile + per-batch K/V blocks (batch dim squeezed away).
                pl.BlockSpec((None, TQ, D), lambda b, qt: (b, qt, 0)),  # Q tile
                pl.BlockSpec((None, Lk, D), lambda b, qt: (b, 0, 0)),   # K (qt-invariant)
                pl.BlockSpec((None, Lk, D), lambda b, qt: (b, 0, 0)),   # V (qt-invariant)
                # Fused weights, constant index_map -> stay resident, no re-DMA.
                pl.BlockSpec((D, num_heads * d_k), lambda b, qt: (0, 0)),  # Wq
                pl.BlockSpec((D, num_heads * d_k), lambda b, qt: (0, 0)),  # Wk
                pl.BlockSpec((D, num_heads * d_v), lambda b, qt: (0, 0)),  # Wv
                pl.BlockSpec((num_heads * d_v, D), lambda b, qt: (0, 0)),  # Wo
            ],
            out_specs=pl.BlockSpec((None, TQ, D), lambda b, qt: (b, qt, 0)),
            scratch_shapes=[
                # Head-batched K/V projections, cached across all query tiles of a batch.
                pltpu.VMEM((num_heads, Lk, d_k), matmul_dtype),
                pltpu.VMEM((num_heads, Lk, d_v), matmul_dtype),
            ],
        ),
        compiler_params=pltpu.CompilerParams(
            # qt axis is "arbitrary": sequential per batch so the pl.when(qt==0)
            # K/V-projection cache is valid; batch axis stays parallel (megacore).
            dimension_semantics=("parallel", "arbitrary"),
            vmem_limit_bytes=vmem_limit),
    )(Q, K, V, Wq_c, Wk_c, Wv_c, Wo_c)


def multi_head_attention_ref(Q, K, V, Wq, Wk, Wv, Wo, *, num_heads, d_k, d_v,
                             mask=False):
    """Pure-JAX reference mirroring the PyTorch module."""
    B, Lq, D = Q.shape
    Lk = K.shape[1]
    qh = (Q @ Wq).reshape(B, Lq, num_heads, d_k).transpose(0, 2, 1, 3)
    kh = (K @ Wk).reshape(B, Lk, num_heads, d_k).transpose(0, 2, 1, 3)
    vh = (V @ Wv).reshape(B, Lk, num_heads, d_v).transpose(0, 2, 1, 3)
    s = jnp.einsum('bhqd,bhkd->bhqk', qh, kh) / math.sqrt(d_k)
    if mask:
        tri = jnp.tril(jnp.ones((Lq, Lk)))
        s = jnp.where(tri == 0, -1e9, s)
    p = jax.nn.softmax(s, axis=-1)
    oh = jnp.einsum('bhqk,bhkv->bhqv', p, vh)
    out = oh.transpose(0, 2, 1, 3).reshape(B, Lq, num_heads * d_v)
    return out @ Wo


def _make_inputs(key, batch, len_q, len_k, d_model, num_heads, d_k, d_v):
    kq, kk, kv, kwq, kwk, kwv, kwo = jax.random.split(key, 7)
    Q = jax.random.normal(kq, (batch, len_q, d_model), jnp.float32)
    K = jax.random.normal(kk, (batch, len_k, d_model), jnp.float32)
    V = jax.random.normal(kv, (batch, len_k, d_model), jnp.float32)
    scale = 1.0 / math.sqrt(d_model)
    Wq = jax.random.normal(kwq, (d_model, num_heads * d_k), jnp.float32) * scale
    Wk = jax.random.normal(kwk, (d_model, num_heads * d_k), jnp.float32) * scale
    Wv = jax.random.normal(kwv, (d_model, num_heads * d_v), jnp.float32) * scale
    Wo = jax.random.normal(kwo, (num_heads * d_v, d_model), jnp.float32) * scale
    return Q, K, V, Wq, Wk, Wv, Wo


if __name__ == "__main__":
    num_heads, d_model, d_k, d_v = 4, 32, 8, 8
    key = jax.random.PRNGKey(0)
    k1, k2 = jax.random.split(key)

    # --- Case 1: small shapes consistent with the module (single query tile). ---
    Q, K, V, Wq, Wk, Wv, Wo = _make_inputs(k1, 2, 8, 8, d_model, num_heads, d_k, d_v)
    for use_mask in (False, True):
        # Strict f32 path (1e-4 tolerance).
        out = multi_head_attention(Q, K, V, Wq, Wk, Wv, Wo,
                                   num_heads=num_heads, d_k=d_k, d_v=d_v,
                                   mask=use_mask, matmul_dtype=jnp.float32)
        out = jax.block_until_ready(out)
        ref = multi_head_attention_ref(Q, K, V, Wq, Wk, Wv, Wo,
                                       num_heads=num_heads, d_k=d_k, d_v=d_v,
                                       mask=use_mask)
        assert out.shape == (2, 8, d_model)
        assert jnp.allclose(out, ref, atol=1e-4, rtol=1e-4), \
            f"f32 mismatch vs reference (mask={use_mask})"

        # Default bf16 MXU-operand path (f32 accumulation/softmax): looser tolerance.
        out_bf16 = multi_head_attention(Q, K, V, Wq, Wk, Wv, Wo,
                                        num_heads=num_heads, d_k=d_k, d_v=d_v,
                                        mask=use_mask)
        out_bf16 = jax.block_until_ready(out_bf16)
        max_err = float(jnp.max(jnp.abs(out_bf16 - ref)))
        assert max_err < 5e-2, f"bf16 mismatch (mask={use_mask}): max abs err {max_err}"

    # --- Case 2: multi-query-tile path (Lq tiling + cached K/V projections). ---
    Q2, K2, V2, Wq2, Wk2, Wv2, Wo2 = _make_inputs(
        k2, 2, 32, 16, d_model, num_heads, d_k, d_v)
    for use_mask in (False, True):
        out2 = multi_head_attention(Q2, K2, V2, Wq2, Wk2, Wv2, Wo2,
                                    num_heads=num_heads, d_k=d_k, d_v=d_v,
                                    mask=use_mask, matmul_dtype=jnp.float32,
                                    q_block_size=8)
        out2 = jax.block_until_ready(out2)
        ref2 = multi_head_attention_ref(Q2, K2, V2, Wq2, Wk2, Wv2, Wo2,
                                        num_heads=num_heads, d_k=d_k, d_v=d_v,
                                        mask=use_mask)
        assert out2.shape == (2, 32, d_model)
        assert jnp.allclose(out2, ref2, atol=1e-4, rtol=1e-4), \
            f"tiled f32 mismatch vs reference (mask={use_mask})"

    print("KERNEL_OK")
</pallas_src>

<mosaic_0001>
module attributes {stable_mosaic.version = 11 : i64} {
  func.func @_mha_kernel(%arg0: i32, %arg1: i32, %arg2: memref<1x8x32xf32, #tpu.memory_space<vmem>>, %arg3: memref<1x8x32xf32, #tpu.memory_space<vmem>>, %arg4: memref<1x8x32xf32, #tpu.memory_space<vmem>>, %arg5: memref<32x32xf32, #tpu.memory_space<vmem>>, %arg6: memref<32x32xf32, #tpu.memory_space<vmem>>, %arg7: memref<32x32xf32, #tpu.memory_space<vmem>>, %arg8: memref<32x32xf32, #tpu.memory_space<vmem>>, %arg9: memref<1x8x32xf32, #tpu.memory_space<vmem>>, %arg10: memref<4x8x8xf32, #tpu.memory_space<vmem>>, %arg11: memref<4x8x8xf32, #tpu.memory_space<vmem>>) attributes {dimension_semantics = [#tpu.dimension_semantics<parallel>, #tpu.dimension_semantics<arbitrary>], iteration_bounds = array<i64: 2, 1>, scalar_prefetch = 0 : i64, scratch_operands = 2 : i64, tpu.core_type = #tpu.core_type<tc>, window_params = [{transform_indices = @transform_0, window_bounds = array<i64: 1, 8, 32>}, {transform_indices = @transform_1, window_bounds = array<i64: 1, 8, 32>}, {transform_indices = @transform_2, window_bounds = array<i64: 1, 8, 32>}, {pipeline_mode = #tpu.pipeline_mode<synchronous>, transform_indices = @transform_3, window_bounds = array<i64: 32, 32>}, {pipeline_mode = #tpu.pipeline_mode<synchronous>, transform_indices = @transform_4, window_bounds = array<i64: 32, 32>}, {pipeline_mode = #tpu.pipeline_mode<synchronous>, transform_indices = @transform_5, window_bounds = array<i64: 32, 32>}, {pipeline_mode = #tpu.pipeline_mode<synchronous>, transform_indices = @transform_6, window_bounds = array<i64: 32, 32>}, {transform_indices = @transform_7, window_bounds = array<i64: 1, 8, 32>}]} {
    %c0_i32 = arith.constant 0 : i32
    %0 = arith.cmpi eq, %arg1, %c0_i32 : i32
    %1 = arith.extui %0 : i1 to i32
    %c0_i32_0 = arith.constant 0 : i32
    %2 = arith.cmpi ne, %1, %c0_i32_0 : i32
    scf.if %2 {
      %c0_22 = arith.constant 0 : index
      %c0_23 = arith.constant 0 : index
      %c0_24 = arith.constant 0 : index
      %46 = vector.load %arg3[%c0_22, %c0_23, %c0_24] : memref<1x8x32xf32, #tpu.memory_space<vmem>>, vector<1x8x32xf32>
      %47 = vector.shape_cast %46 : vector<1x8x32xf32> to vector<8x32xf32>
      %c0_25 = arith.constant 0 : index
      %c0_26 = arith.constant 0 : index
      %c0_27 = arith.constant 0 : index
      %48 = vector.load %arg4[%c0_25, %c0_26, %c0_27] : memref<1x8x32xf32, #tpu.memory_space<vmem>>, vector<1x8x32xf32>
      %49 = vector.shape_cast %48 : vector<1x8x32xf32> to vector<8x32xf32>
      %c0_28 = arith.constant 0 : index
      %c0_29 = arith.constant 0 : index
      %50 = vector.load %arg6[%c0_28, %c0_29] : memref<32x32xf32, #tpu.memory_space<vmem>>, vector<32x32xf32>
      %cst_30 = arith.constant dense<0.000000e+00> : vector<8x32xf32>
      %51 = tpu.matmul %47, %50, %cst_30 {dimension_numbers = #tpu.dot_dimension_numbers<[1], [0], [0], [1], [0, 0, 1, 1], [], []>} : vector<8x32xf32>, vector<32x32xf32>, vector<8x32xf32> -> vector<8x32xf32>
      %c0_31 = arith.constant 0 : index
      %c0_32 = arith.constant 0 : index
      %52 = vector.load %arg7[%c0_31, %c0_32] : memref<32x32xf32, #tpu.memory_space<vmem>>, vector<32x32xf32>
      %cst_33 = arith.constant dense<0.000000e+00> : vector<8x32xf32>
      %53 = tpu.matmul %49, %52, %cst_33 {dimension_numbers = #tpu.dot_dimension_numbers<[1], [0], [0], [1], [0, 0, 1, 1], [], []>} : vector<8x32xf32>, vector<32x32xf32>, vector<8x32xf32> -> vector<8x32xf32>
      %54 = vector.extract_strided_slice %51 {offsets = [0, 0], sizes = [8, 8], strides = [1, 1]} : vector<8x32xf32> to vector<8x8xf32>
      %55 = vector.extract_strided_slice %51 {offsets = [0, 8], sizes = [8, 8], strides = [1, 1]} : vector<8x32xf32> to vector<8x8xf32>
      %56 = vector.extract_strided_slice %51 {offsets = [0, 16], sizes = [8, 8], strides = [1, 1]} : vector<8x32xf32> to vector<8x8xf32>
      %57 = vector.extract_strided_slice %51 {offsets = [0, 24], sizes = [8, 8], strides = [1, 1]} : vector<8x32xf32> to vector<8x8xf32>
      %58 = vector.shape_cast %54 : vector<8x8xf32> to vector<1x8x8xf32>
      %59 = vector.shape_cast %55 : vector<8x8xf32> to vector<1x8x8xf32>
      %60 = vector.shape_cast %56 : vector<8x8xf32> to vector<1x8x8xf32>
      %61 = vector.shape_cast %57 : vector<8x8xf32> to vector<1x8x8xf32>
      %62 = tpu.concatenate %58, %59, %60, %61 in 0 : vector<1x8x8xf32>, vector<1x8x8xf32>, vector<1x8x8xf32>, vector<1x8x8xf32> -> vector<4x8x8xf32>
      %c0_34 = arith.constant 0 : index
      %c0_35 = arith.constant 0 : index
      %c0_36 = arith.constant 0 : index
      %63 = vector.load %arg10[%c0_34, %c0_35, %c0_36] : memref<4x8x8xf32, #tpu.memory_space<vmem>>, vector<4x8x8xf32>
      tpu.vector_store %arg10[%c0_34, %c0_35, %c0_36], %62 {strides = array<i32>} : memref<4x8x8xf32, #tpu.memory_space<vmem>>, vector<4x8x8xf32>,
      %64 = vector.extract_strided_slice %53 {offsets = [0, 0], sizes = [8, 8], strides = [1, 1]} : vector<8x32xf32> to vector<8x8xf32>
      %65 = vector.extract_strided_slice %53 {offsets = [0, 8], sizes = [8, 8], strides = [1, 1]} : vector<8x32xf32> to vector<8x8xf32>
      %66 = vector.extract_strided_slice %53 {offsets = [0, 16], sizes = [8, 8], strides = [1, 1]} : vector<8x32xf32> to vector<8x8xf32>
      %67 = vector.extract_strided_slice %53 {offsets = [0, 24], sizes = [8, 8], strides = [1, 1]} : vector<8x32xf32> to vector<8x8xf32>
      %68 = vector.shape_cast %64 : vector<8x8xf32> to vector<1x8x8xf32>
      %69 = vector.shape_cast %65 : vector<8x8xf32> to vector<1x8x8xf32>
      %70 = vector.shape_cast %66 : vector<8x8xf32> to vector<1x8x8xf32>
      %71 = vector.shape_cast %67 : vector<8x8xf32> to vector<1x8x8xf32>
      %72 = tpu.concatenate %68, %69, %70, %71 in 0 : vector<1x8x8xf32>, vector<1x8x8xf32>, vector<1x8x8xf32>, vector<1x8x8xf32> -> vector<4x8x8xf32>
      %c0_37 = arith.constant 0 : index
      %c0_38 = arith.constant 0 : index
      %c0_39 = arith.constant 0 : index
      %73 = vector.load %arg11[%c0_37, %c0_38, %c0_39] : memref<4x8x8xf32, #tpu.memory_space<vmem>>, vector<4x8x8xf32>
      tpu.vector_store %arg11[%c0_37, %c0_38, %c0_39], %72 {strides = array<i32>} : memref<4x8x8xf32, #tpu.memory_space<vmem>>, vector<4x8x8xf32>,
    } else {
    }
    %c0 = arith.constant 0 : index
    %c0_1 = arith.constant 0 : index
    %c0_2 = arith.constant 0 : index
    %3 = vector.load %arg2[%c0, %c0_1, %c0_2] : memref<1x8x32xf32, #tpu.memory_space<vmem>>, vector<1x8x32xf32>
    %4 = vector.shape_cast %3 : vector<1x8x32xf32> to vector<8x32xf32>
    %c0_3 = arith.constant 0 : index
    %c0_4 = arith.constant 0 : index
    %5 = vector.load %arg5[%c0_3, %c0_4] : memref<32x32xf32, #tpu.memory_space<vmem>>, vector<32x32xf32>
    %cst = arith.constant dense<0.000000e+00> : vector<8x32xf32>
    %6 = tpu.matmul %4, %5, %cst {dimension_numbers = #tpu.dot_dimension_numbers<[1], [0], [0], [1], [0, 0, 1, 1], [], []>} : vector<8x32xf32>, vector<32x32xf32>, vector<8x32xf32> -> vector<8x32xf32>
    %cst_5 = arith.constant 0.353553385 : f32
    %7 = vector.broadcast %cst_5 : f32 to vector<8x32xf32>
    %8 = arith.mulf %6, %7 : vector<8x32xf32>
    %9 = vector.extract_strided_slice %8 {offsets = [0, 0], sizes = [8, 8], strides = [1, 1]} : vector<8x32xf32> to vector<8x8xf32>
    %10 = vector.extract_strided_slice %8 {offsets = [0, 8], sizes = [8, 8], strides = [1, 1]} : vector<8x32xf32> to vector<8x8xf32>
    %11 = vector.extract_strided_slice %8 {offsets = [0, 16], sizes = [8, 8], strides = [1, 1]} : vector<8x32xf32> to vector<8x8xf32>
    %12 = vector.extract_strided_slice %8 {offsets = [0, 24], sizes = [8, 8], strides = [1, 1]} : vector<8x32xf32> to vector<8x8xf32>
    %13 = vector.shape_cast %9 : vector<8x8xf32> to vector<1x8x8xf32>
    %14 = vector.shape_cast %10 : vector<8x8xf32> to vector<1x8x8xf32>
    %15 = vector.shape_cast %11 : vector<8x8xf32> to vector<1x8x8xf32>
    %16 = vector.shape_cast %12 : vector<8x8xf32> to vector<1x8x8xf32>
    %17 = tpu.concatenate %13, %14, %15, %16 in 0 : vector<1x8x8xf32>, vector<1x8x8xf32>, vector<1x8x8xf32>, vector<1x8x8xf32> -> vector<4x8x8xf32>
    %c0_6 = arith.constant 0 : index
    %c0_7 = arith.constant 0 : index
    %c0_8 = arith.constant 0 : index
    %18 = vector.load %arg10[%c0_6, %c0_7, %c0_8] : memref<4x8x8xf32, #tpu.memory_space<vmem>>, vector<4x8x8xf32>
    "tpu.trace_start"() <{level = 10 : i32, message = "hqd,hkd->hqk"}> : () -> ()
    %cst_9 = arith.constant dense<0.000000e+00> : vector<4x8x8xf32>
    %19 = tpu.matmul %17, %18, %cst_9 {dimension_numbers = #tpu.dot_dimension_numbers<[2], [2], [1], [1], [0, 0, 0, 1, 1, 1], [0], [0]>} : vector<4x8x8xf32>, vector<4x8x8xf32>, vector<4x8x8xf32> -> vector<4x8x8xf32>
    "tpu.trace_stop"() : () -> ()
    %cst_10 = arith.constant dense<0xFF800000> : vector<4x8xf32>
    %20 = vector.multi_reduction <maximumf>, %19, %cst_10 [2] : vector<4x8x8xf32> to vector<4x8xf32>
    %21 = vector.shape_cast %20 : vector<4x8xf32> to vector<4x8x1xf32>
    %22 = vector.broadcast %21 : vector<4x8x1xf32> to vector<4x8x8xf32>
    %23 = arith.subf %19, %22 : vector<4x8x8xf32>
    %24 = math.exp %23 : vector<4x8x8xf32>
    %cst_11 = arith.constant dense<0.000000e+00> : vector<4x8xf32>
    %25 = vector.multi_reduction <add>, %24, %cst_11 [2] : vector<4x8x8xf32> to vector<4x8xf32>
    %26 = vector.shape_cast %25 : vector<4x8xf32> to vector<4x8x1xf32>
    %c0_12 = arith.constant 0 : index
    %c0_13 = arith.constant 0 : index
    %c0_14 = arith.constant 0 : index
    %27 = vector.load %arg11[%c0_12, %c0_13, %c0_14] : memref<4x8x8xf32, #tpu.memory_space<vmem>>, vector<4x8x8xf32>
    "tpu.trace_start"() <{level = 10 : i32, message = "hqk,hkv->hqv"}> : () -> ()
    %cst_15 = arith.constant dense<0.000000e+00> : vector<4x8x8xf32>
    %28 = tpu.matmul %24, %27, %cst_15 {dimension_numbers = #tpu.dot_dimension_numbers<[2], [1], [1], [2], [0, 0, 0, 1, 1, 2], [0], [0]>} : vector<4x8x8xf32>, vector<4x8x8xf32>, vector<4x8x8xf32> -> vector<4x8x8xf32>
    "tpu.trace_stop"() : () -> ()
    %29 = tpu.reciprocal %26 : vector<4x8x1xf32> -> vector<4x8x1xf32>
    %30 = vector.broadcast %29 : vector<4x8x1xf32> to vector<4x8x8xf32>
    %31 = arith.mulf %28, %30 : vector<4x8x8xf32>
    %32 = vector.extract_strided_slice %31 {offsets = [0, 0, 0], sizes = [1, 8, 8], strides = [1, 1, 1]} : vector<4x8x8xf32> to vector<1x8x8xf32>
    %33 = vector.shape_cast %32 : vector<1x8x8xf32> to vector<8x8xf32>
    %34 = vector.extract_strided_slice %31 {offsets = [1, 0, 0], sizes = [1, 8, 8], strides = [1, 1, 1]} : vector<4x8x8xf32> to vector<1x8x8xf32>
    %35 = vector.shape_cast %34 : vector<1x8x8xf32> to vector<8x8xf32>
    %36 = vector.extract_strided_slice %31 {offsets = [2, 0, 0], sizes = [1, 8, 8], strides = [1, 1, 1]} : vector<4x8x8xf32> to vector<1x8x8xf32>
    %37 = vector.shape_cast %36 : vector<1x8x8xf32> to vector<8x8xf32>
    %38 = vector.extract_strided_slice %31 {offsets = [3, 0, 0], sizes = [1, 8, 8], strides = [1, 1, 1]} : vector<4x8x8xf32> to vector<1x8x8xf32>
    %39 = vector.shape_cast %38 : vector<1x8x8xf32> to vector<8x8xf32>
    %40 = tpu.concatenate %33, %35, %37, %39 in 1 : vector<8x8xf32>, vector<8x8xf32>, vector<8x8xf32>, vector<8x8xf32> -> vector<8x32xf32>
    %c0_16 = arith.constant 0 : index
    %c0_17 = arith.constant 0 : index
    %41 = vector.load %arg8[%c0_16, %c0_17] : memref<32x32xf32, #tpu.memory_space<vmem>>, vector<32x32xf32>
    %cst_18 = arith.constant dense<0.000000e+00> : vector<8x32xf32>
    %42 = tpu.matmul %40, %41, %cst_18 {dimension_numbers = #tpu.dot_dimension_numbers<[1], [0], [0], [1], [0, 0, 1, 1], [], []>} : vector<8x32xf32>, vector<32x32xf32>, vector<8x32xf32> -> vector<8x32xf32>
    %c0_19 = arith.constant 0 : index
    %c0_20 = arith.constant 0 : index
    %c0_21 = arith.constant 0 : index
    %43 = vector.load %arg9[%c0_19, %c0_20, %c0_21] : memref<1x8x32xf32, #tpu.memory_space<vmem>>, vector<1x8x32xf32>
    %44 = vector.shape_cast %43 : vector<1x8x32xf32> to vector<8x32xf32>
    %45 = vector.shape_cast %42 : vector<8x32xf32> to vector<1x8x32xf32>
    tpu.vector_store %arg9[%c0_19, %c0_20, %c0_21], %45 {strides = array<i32>} : memref<1x8x32xf32, #tpu.memory_space<vmem>>, vector<1x8x32xf32>,
    return
  }
  func.func @transform_0(%arg0: i32, %arg1: i32) -> (i32, i32, i32) {
    %c0_i32 = arith.constant 0 : i32
    %c0_i32_0 = arith.constant 0 : i32
    return %arg0, %arg1, %c0_i32 : i32, i32, i32
  }
  func.func @transform_1(%arg0: i32, %arg1: i32) -> (i32, i32, i32) {
    %c0_i32 = arith.constant 0 : i32
    %c0_i32_0 = arith.constant 0 : i32
    %c0_i32_1 = arith.constant 0 : i32
    return %arg0, %c0_i32, %c0_i32_0 : i32, i32, i32
  }
  func.func @transform_2(%arg0: i32, %arg1: i32) -> (i32, i32, i32) {
    %c0_i32 = arith.constant 0 : i32
    %c0_i32_0 = arith.constant 0 : i32
    %c0_i32_1 = arith.constant 0 : i32
    return %arg0, %c0_i32, %c0_i32_0 : i32, i32, i32
  }
  func.func @transform_3(%arg0: i32, %arg1: i32) -> (i32, i32) {
    %c0_i32 = arith.constant 0 : i32
    %c0_i32_0 = arith.constant 0 : i32
    %c0_i32_1 = arith.constant 0 : i32
    return %c0_i32, %c0_i32_0 : i32, i32
  }
  func.func @transform_4(%arg0: i32, %arg1: i32) -> (i32, i32) {
    %c0_i32 = arith.constant 0 : i32
    %c0_i32_0 = arith.constant 0 : i32
    %c0_i32_1 = arith.constant 0 : i32
    return %c0_i32, %c0_i32_0 : i32, i32
  }
  func.func @transform_5(%arg0: i32, %arg1: i32) -> (i32, i32) {
    %c0_i32 = arith.constant 0 : i32
    %c0_i32_0 = arith.constant 0 : i32
    %c0_i32_1 = arith.constant 0 : i32
    return %c0_i32, %c0_i32_0 : i32, i32
  }
  func.func @transform_6(%arg0: i32, %arg1: i32) -> (i32, i32) {
    %c0_i32 = arith.constant 0 : i32
    %c0_i32_0 = arith.constant 0 : i32
    %c0_i32_1 = arith.constant 0 : i32
    return %c0_i32, %c0_i32_0 : i32, i32
  }
  func.func @transform_7(%arg0: i32, %arg1: i32) -> (i32, i32, i32) {
    %c0_i32 = arith.constant 0 : i32
    %c0_i32_0 = arith.constant 0 : i32
    return %arg0, %arg1, %c0_i32 : i32, i32, i32
  }
}

</mosaic_0001>

<bundles_post_ra>
// kernel: tpu_custom_call.1
= control target key start
LH: loop header
LB: loop body
LE: loop exit
PB: predicated region body
PF: predicated region fallthrough
CT: control target
= control target key end

     0   :  { %s2783_s0 = inlined_call_operand.hbm [shape: f32[2,8,32], index: 0, kind: input, shape index: {}]   ;;  %s2784_s1 = inlined_call_operand.hbm [shape: f32[2,8,32], index: 1, kind: input, shape index: {}]   ;;  %s2785_s2 = inlined_call_operand.hbm [shape: f32[2,8,32], index: 2, kind: input, shape index: {}]   ;;  %s2786_s3 = inlined_call_operand.hbm [shape: f32[32,32], index: 3, kind: input, shape index: {}]   ;;  %s2787_s4 = inlined_call_operand.hbm [shape: f32[32,32], index: 4, kind: input, shape index: {}]   ;;  %s2788_s5 = inlined_call_operand.hbm [shape: f32[32,32], index: 5, kind: input, shape index: {}]   ;;  %s2789_s6 = inlined_call_operand.hbm [shape: f32[32,32], index: 6, kind: input, shape index: {}]   ;;  %s2790_s7 = inlined_call_operand.hbm [shape: f32[2,8,32], index: 7, kind: output, shape index: {}]  }
   0x1   :  { %2815 = sst [smem:[#allocation28_spill]] %s2784_s1 }
   0x2   :  { %2816 = sst [smem:[#allocation29_spill]] %s2786_s3 }
   0x3   :  { %2817 = sst [smem:[#allocation30_spill]] %s2788_s5 }
   0x4   :  { %2818 = sst [smem:[#allocation31_spill]] %s2790_s7 }
   0x5   :  { %12 = vsyncpa [#allocation5], 0 }
   0x6   :  { %14 = vsyncpa [#allocation5 + $0x1], 0 }
   0x7   :  { %15 = vsyncpa [#allocation8], 0 }
   0x8   :  { %17 = vsyncpa [#allocation8 + $0x1], 0 }
   0x9   :  { %18 = vsyncpa [#allocation11], 0 }
   0xa   :  { %19 = vsyncpa [#allocation14], 0 }
   0xb   :  { %20 = vsyncpa [#allocation6], 0 }
   0xc   :  { %22 = vsyncpa [#allocation6 + $0x1], 0  ;;  %s2317_s24 = smov 0   ;;  %s2319_s25 = smov 0  }
   0xd   :  { %s2321_s26 = smov 0   ;;  %s2323_s27 = smov 0  }
   0xe   :  { %s2325_s28 = smov 0   ;;  %s2327_s29 = smov 0  }
   0xf LB: > { %2819 = sst [smem:[#allocation22_spill]] %s2236_s24  ;;  %s2348_s30 = sadd.s32 4294967295, %s2256_s29   ;;  %s2256_s29 = sphi %s2327_s29, %s28_s29   ;;  %s2252_s28 = sphi %s2325_s28, %s2860_s28   ;;  %s2248_s27 = sphi %s2323_s27, %s2859_s27   ;;  %s2244_s26 = sphi %s2321_s26, %s2863_s26   ;;  %s2240_s25 = sphi %s2319_s25, %s2862_s25   ;;  %s2236_s24 = sphi %s2317_s24, %s2861_s24  }
  0x10   : > { %2820 = sst [smem:[#allocation23_spill]] %s2252_s28  ;;  %p1635_p0 = scmp.ge.s32.totalorder %s2256_s29, 1 }
  0x11   : > { %2821 = sst [smem:[#allocation24_spill]] %s2256_s29  ;;  %p2800_p1 = scmp.eq.s32.totalorder %s2348_s30, 0 }
  0x12   : > { %p237_p2 = scmp.lt.s32.totalorder %s2256_s29, 3  ;;  %s2258_s9 = smov [#allocation10]  }
  0x13   : > { %s249_s10 = sshll.u32 %s2258_s9, 4  ;;  %s2259_s12 = smov [#allocation13]   ;;  %s2357_s10 = int_to_ptr.vmem [resolvable:$true] %s249_s10 }
  0x14   : > { %p2353_p3 = pnand %p1635_p0, %p237_p2  ;;  %s275_s13 = sshll.u32 %s2259_s12, 4  ;;  %s2368_s13 = int_to_ptr.vmem [resolvable:$true] %s275_s13 }
  0x15   : > { %s2824_s3 = sld [smem:[#allocation29_spill]] }
  0x16   : > { %s2822_s8 = scalar_select %p2353_p3, 1, 0 }
  0x17   : > { %p1844_p4 = pneg %p2353_p3 }
  0x19   : > { %p2364_p6 = pnand %p1844_p4, %p2800_p1 }
  0x1b   : > { %s2823_s11 = scalar_select %p2364_p6, 1, 0 }
  0x1c   : > { %s1960_s16 = scalar_lea.hbm %s2824_s3, 512  ;;  %p2378_p8 = pneg %p2364_p6 }
  0x1d   : > { %p1961_p7 = scmp.ne.s32.totalorder %s2824_s3, %s1960_s16  ;;  %p1967_p11 = scmp.lt.u32.totalorder %s1960_s16, %s2824_s3 }
  0x1e   : > { %s2825_s19 = scalar_select %p2378_p8, 1, 0 }
  0x1f   : > { %p1963_p9 = pnand %p2378_p8, %p1961_p7 }
  0x21   : > { %p1964_p10 = pneg %p1963_p9 }
  0x23   : > { %p1969_p12 = pnand %p1967_p11, %p1964_p10 }
  0x25   : > { %1972 = shalt.err (!%p1969_p12)
}
  0x26   : > { %s1973_s22 = scalar_lea.vmem %s2357_s10, 512  ;;  %p1981_p4 = scmp.lt.s32.totalorder %s2357_s10, %s2357_s10 }
  0x27   : > { %p1974_p13 = scmp.ne.s32.totalorder %s2357_s10, %s1973_s22  ;;  %p1982_p5 = scmp.lt.s32.totalorder %s1973_s22, %s1973_s22 }
  0x29   : > { %p1976_p0 = pnand %p1974_p13, %p2378_p8  ;;  %p1983_p7 = por %p1982_p5, %p1981_p4 }
  0x2b   : > { %p1977_p2 = pneg %p1976_p0 }
  0x2d   : > { %p1984_p9 = pnand %p1983_p7, %p1977_p2 }
  0x2f   : > { %1987 = shalt.err (!%p1984_p9)
}
  0x30   : > { %s2791_s23 = smov 128   ;;  %s2793_s9 = smov 8  }
  0x31   : > { %1847 = dma.hbm_to_vmem [thread:$0]  (!%p2364_p6), %s2824_s3, 512, %s2357_s10, [#allocation11], %s2791_s23, %s2791_s23, %s2793_s9  }
  0x32   : > { %s2826_s5 = sld [smem:[#allocation30_spill]] }
  0x38   : > { %s1988_s17 = scalar_lea.hbm %s2826_s5, 512 }
  0x39   : > { %p1989_p5 = scmp.ne.s32.totalorder %s2826_s5, %s1988_s17  ;;  %p1995_p12 = scmp.lt.u32.totalorder %s1988_s17, %s2826_s5 }
  0x3b   : > { %p1991_p10 = pnand %p1989_p5, %p2378_p8 }
  0x3d   : > { %p1992_p11 = pneg %p1991_p10 }
  0x3f   : > { %p1997_p13 = pnand %p1995_p12, %p1992_p11 }
  0x41   : > { %2000 = shalt.err (!%p1997_p13)
}
  0x42   : > { %s2001_s10 = scalar_lea.vmem %s2368_s13, 512  ;;  %p2009_p7 = scmp.lt.s32.totalorder %s2368_s13, %s2368_s13 }
  0x43   : > { %p2002_p0 = scmp.ne.s32.totalorder %s2368_s13, %s2001_s10  ;;  %p2010_p9 = scmp.lt.s32.totalorder %s2001_s10, %s2001_s10 }
  0x45   : > { %p2004_p2 = pnand %p2002_p0, %p2378_p8  ;;  %p2011_p5 = por %p2010_p9, %p2009_p7 }
  0x47   : > { %p2005_p4 = pneg %p2004_p2 }
  0x49   : > { %p2012_p10 = pnand %p2011_p5, %p2005_p4 }
  0x4b   : > { %2015 = shalt.err (!%p2012_p10)
}
  0x4c   : > { %1853 = dma.hbm_to_vmem [thread:$0]  (!%p2364_p6), %s2826_s5, 512, %s2368_s13, [#allocation14], %s2791_s23, %s2791_s23, %s2793_s9  }
  0x4d   : > { %s1634_s15 = sadd.s32 4294967294, %s2256_s29   ;;  %s40_s16 = sadd.s32 1, %s2252_s28 }
  0x4e   : > { %p42_p11 = scmp.ge.s32.totalorder %s40_s16, 2  ;;  %s49_s17 = sadd.s32 1, %s2244_s26 }
  0x4f   : > { %p56_p12 = scmp.ne.s32.totalorder %s2244_s26, %s2240_s25  ;;  %p57_p13 = scmp.eq.s32.totalorder %s2256_s29, 0 }
  0x50   : > { %s2865_s16 = smov (%p42_p11, %s40_s16), 0  ;;  %p62_p2 = scmp.ne.s32.totalorder %s2240_s25, %s2236_s24 }
  0x51   : > { %2827 = sst [smem:[#allocation25_spill]] %s2865_s16  ;;  %p2436_p0 = por %p57_p13, %p56_p12 }
  0x52   : > { %s44_s13 = ssub.s32 %s2252_s28, %s2865_s16  ;;  %p224_p4 = scmp.eq.s32.totalorder %s2348_s30, 1 }
  0x53   : > { %p47_p7 = scmp.eq.s32.totalorder %s44_s13, 0  ;;  %p2447_p9 = por %p2800_p1, %p62_p2 }
  0x54   : > { %p2451_p5 = por %p224_p4, %p56_p12  ;;  %p230_p10 = scmp.eq.s32.totalorder %s1634_s15, 1 }
  0x55   : > { %s2829_s20 = scalar_select %p2447_p9, 1, 0 }
  0x56   : > { %s2830_s21 = scalar_select %p2451_p5, 1, 0 }
  0x57   : > { %s2456_s22 = scalar_select %p47_p7, %s2244_s26, %s49_s17  }
  0x58   : > { %p2458_p11 = por %p230_p10, %p62_p2  ;;  %p1875_p13 = scmp.lt.s32.totalorder %s2256_s29, 2 }
  0x59   : > { %2831 = sst [smem:[#allocation26_spill]] %s2456_s22  ;;  %s2795_s12 = sand.u32 1, %s2244_s26  }
  0x5a   : > { %s2832_s10 = scalar_select %p2458_p11, 1, 0 }
  0x5b   : > { %s2465_s14 = sshll.u32 %s2252_s28, 7  ;;  %s2469_s13 = sshll.u32 %s2795_s12, 3 }
  0x5c   : > { %2833 = sst [smem:[#allocation27_spill]] %s2832_s10  ;;  %p2473_p12 = pnand %p1875_p13, %p2436_p0 }
  0x5d   : > { %s321_s15 = sand.u32 1, %s2256_s29   ;;  %s2835_s1 = sld [smem:[#allocation28_spill]] }
  0x5e   : > { %s2834_s23 = scalar_select %p2473_p12, 1, 0 }
  0x5f   : > { %s325_s5 = scalar_lea.vmem [#allocation7], %s2469_s13  ;;  %s2487_s18 = scalar_lea.sflag [#allocation8], %s321_s15 }
  0x60   : > { %s332_s12 = sshll.u32 %s325_s5, 4  ;;  %p2493_p2 = pneg %p2473_p12  ;;  %s2485_s12 = int_to_ptr.vmem [resolvable:$true] %s332_s12 }
  0x62   : > { %s2836_s28 = scalar_select %p2493_p2, 1, 0 }
  0x63   : > { %s2482_s3 = scalar_lea.hbm %s2835_s1, %s2465_s14  ;;  %s2021_s22 = scalar_lea.hbm %s2835_s1, 256 }
  0x64   : > { %s2016_s16 = scalar_lea.hbm %s2482_s3, 128  ;;  %p2022_p10 = scmp.lt.u32.totalorder %s2482_s3, %s2835_s1 }
  0x65   : > { %p2017_p0 = scmp.ne.s32.totalorder %s2482_s3, %s2016_s16  ;;  %p2023_p13 = scmp.lt.u32.totalorder %s2021_s22, %s2016_s16 }
  0x66   : > { %p2025_p11 = scmp.lt.u32.totalorder %s2016_s16, %s2482_s3 }
  0x67   : > { %p2019_p4 = pnand %p2493_p2, %p2017_p0  ;;  %p2024_p1 = por %p2023_p13, %p2022_p10 }
  0x69   : > { %p2020_p7 = pneg %p2019_p4  ;;  %p2026_p5 = por %p2025_p11, %p2024_p1 }
  0x6b   : > { %p2027_p9 = pnand %p2026_p5, %p2020_p7 }
  0x6d   : > { %2030 = shalt.err (!%p2027_p9)
}
  0x6e   : > { %s2031_s15 = scalar_lea.vmem %s2485_s12, 128  ;;  %s2262_s9 = smov [#allocation7]  }
  0x6f   : > { %p2032_p0 = scmp.ne.s32.totalorder %s2485_s12, %s2031_s15  ;;  %s2036_s17 = sshll.u32 %s2262_s9, 4  ;;  %s2037_s17 = int_to_ptr.vmem [resolvable:$false] %s2036_s17 }
  0x70   : > { %s2038_s29 = scalar_lea.vmem %s2037_s17, 256  ;;  %p2039_p6 = scmp.lt.s32.totalorder %s2485_s12, %s2037_s17 }
  0x71   : > { %p2034_p4 = pnand %p2032_p0, %p2493_p2  ;;  %p2040_p8 = scmp.lt.s32.totalorder %s2038_s29, %s2031_s15 }
  0x73   : > { %p2035_p3 = pneg %p2034_p4  ;;  %p2041_p10 = por %p2040_p8, %p2039_p6 }
  0x75   : > { %p2042_p13 = pnand %p2041_p10, %p2035_p3 }
  0x77   : > { %2045 = shalt.err (!%p2042_p13)
}
  0x78   : > { %1863 = dma.hbm_to_vmem [thread:$0]  (!%p2473_p12), %s2482_s3, 128, %s2485_s12, %s2487_s18  }
  0x79   : > { %s2263_s16 = smov [#allocation12]   ;;  %s2264_s5 = smov [#allocation15]  }
  0x7a   : > { %s262_s22 = sshll.u32 %s2263_s16, 4  ;;  %s288_s1 = sshll.u32 %s2264_s5, 4  ;;  %s263_s22 = int_to_ptr.vmem [resolvable:$true] %s262_s22  ;;  %s289_s1 = int_to_ptr.vmem [resolvable:$true] %s288_s1 }
  0x7b   : > { %s2046_s17 = scalar_lea.hbm %s2787_s4, 512  ;;  %p2837_p3 = scmp.ne.s32.totalorder %s2825_s19, 0 }
  0x7c   : > { %p2047_p1 = scmp.ne.s32.totalorder %s2787_s4, %s2046_s17  ;;  %p2053_p9 = scmp.lt.u32.totalorder %s2046_s17, %s2787_s4 }
  0x7e   : > { %p2049_p6 = pnand %p2047_p1, %p2837_p3 }
  0x80   : > { %p2050_p8 = pneg %p2049_p6 }
  0x82   : > { %p2055_p5 = pnand %p2053_p9, %p2050_p8 }
  0x84   : > { %2058 = shalt.err (!%p2055_p5)
}
  0x85   : > { %s2059_s3 = scalar_lea.vmem %s263_s22, 512  ;;  %p2067_p4 = scmp.lt.s32.totalorder %s263_s22, %s263_s22 }
  0x86   : > { %p2060_p11 = scmp.ne.s32.totalorder %s263_s22, %s2059_s3  ;;  %p2068_p10 = scmp.lt.s32.totalorder %s2059_s3, %s2059_s3 }
  0x88   : > { %p2062_p7 = pnand %p2060_p11, %p2837_p3  ;;  %p2069_p13 = por %p2068_p10, %p2067_p4 }
  0x8a   : > { %p2063_p0 = pneg %p2062_p7 }
  0x8c   : > { %p2070_p12 = pnand %p2069_p13, %p2063_p0 }
  0x8e   : > { %2073 = shalt.err (!%p2070_p12)
}
  0x8f   : > { %p2838_p1 = scmp.ne.s32.totalorder %s2823_s11, 0  ;;  %s2839_s10 = smov 8  }
  0x90   : > { %s2840_s12 = smov 128   ;;  %s2074_s9 = scalar_lea.hbm %s2789_s6, 512 }
  0x91   : > { %1850 = dma.hbm_to_vmem [thread:$0]  (!%p2838_p1), %s2787_s4, 512, %s263_s22, [#allocation11], %s2840_s12, %s2840_s12, %s2839_s10  }
  0x92   : > { %p2075_p6 = scmp.ne.s32.totalorder %s2789_s6, %s2074_s9  ;;  %p2081_p9 = scmp.lt.u32.totalorder %s2074_s9, %s2789_s6 }
  0x94   : > { %p2077_p12 = pnand %p2075_p6, %p2837_p3 }
  0x96   : > { %p2078_p8 = pneg %p2077_p12 }
  0x98   : > { %p2083_p5 = pnand %p2081_p9, %p2078_p8 }
  0x9a   : > { %2086 = shalt.err (!%p2083_p5)
}
  0x9b   : > { %s2087_s7 = scalar_lea.vmem %s289_s1, 512  ;;  %p2095_p4 = scmp.lt.s32.totalorder %s289_s1, %s289_s1 }
  0x9c   : > { %p2088_p11 = scmp.ne.s32.totalorder %s289_s1, %s2087_s7  ;;  %p2096_p10 = scmp.lt.s32.totalorder %s2087_s7, %s2087_s7 }
  0x9e   : > { %p2090_p7 = pnand %p2088_p11, %p2837_p3  ;;  %p2097_p13 = por %p2096_p10, %p2095_p4 }
  0xa0   : > { %p2091_p0 = pneg %p2090_p7 }
  0xa2   : > { %p2098_p2 = pnand %p2097_p13, %p2091_p0 }
  0xa4   : > { %2101 = shalt.err (!%p2098_p2)
}
  0xa5   : > { %1856 = dma.hbm_to_vmem [thread:$0]  (!%p2838_p1), %s2789_s6, 512, %s289_s1, [#allocation14], %s2840_s12, %s2840_s12, %s2839_s10  }
  0xa6   : > { %s2563_s5 = scalar_lea.hbm %s2783_s0, %s2465_s14  ;;  %s306_s11 = scalar_lea.vmem [#allocation4], %s2469_s13 }
  0xa7   : > { %s314_s9 = sshll.u32 %s306_s11, 4  ;;  %s2572_s29 = scalar_lea.hbm %s2785_s2, %s2465_s14  ;;  %s2566_s9 = int_to_ptr.vmem [resolvable:$true] %s314_s9 }
  0xa8   : > { %s2841_s3 = sand.u32 1, %s2244_s26   ;;  %s2102_s10 = scalar_lea.hbm %s2563_s5, 128 }
  0xa9   : > { %s303_s1 = scalar_lea.sflag [#allocation5], %s2841_s3  ;;  %p2103_p2 = scmp.ne.s32.totalorder %s2563_s5, %s2102_s10 }
  0xaa   : > { %p2842_p3 = scmp.ne.s32.totalorder %s2836_s28, 0  ;;  %s2107_s22 = scalar_lea.hbm %s2783_s0, 256 }
  0xab   : > { %p2108_p12 = scmp.lt.u32.totalorder %s2563_s5, %s2783_s0  ;;  %p2109_p8 = scmp.lt.u32.totalorder %s2107_s22, %s2102_s10 }
  0xac   : > { %p2105_p1 = pnand %p2103_p2, %p2842_p3  ;;  %p2111_p5 = scmp.lt.u32.totalorder %s2102_s10, %s2563_s5 }
  0xad   : > { %p2110_p9 = por %p2109_p8, %p2108_p12 }
  0xae   : > { %p2106_p6 = pneg %p2105_p1 }
  0xaf   : > { %p2112_p11 = por %p2111_p5, %p2110_p9 }
  0xb1   : > { %p2113_p7 = pnand %p2112_p11, %p2106_p6 }
  0xb3   : > { %2116 = shalt.err (!%p2113_p7)
}
  0xb4   : > { %s2117_s14 = scalar_lea.vmem %s2566_s9, 128  ;;  %s2265_s16 = smov [#allocation4]  }
  0xb5   : > { %p2118_p0 = scmp.ne.s32.totalorder %s2566_s9, %s2117_s14  ;;  %s2122_s11 = sshll.u32 %s2265_s16, 4  ;;  %s2123_s11 = int_to_ptr.vmem [resolvable:$false] %s2122_s11 }
  0xb6   : > { %s2124_s17 = scalar_lea.vmem %s2123_s11, 256  ;;  %p2125_p13 = scmp.lt.s32.totalorder %s2566_s9, %s2123_s11 }
  0xb7   : > { %p2120_p4 = pnand %p2118_p0, %p2842_p3  ;;  %p2126_p2 = scmp.lt.s32.totalorder %s2124_s17, %s2117_s14 }
  0xb9   : > { %p2121_p10 = pneg %p2120_p4  ;;  %p2127_p1 = por %p2126_p2, %p2125_p13 }
  0xbb   : > { %p2128_p12 = pnand %p2127_p1, %p2121_p10 }
  0xbd   : > { %2131 = shalt.err (!%p2128_p12)
}
  0xbe   : > { %p2843_p6 = scmp.ne.s32.totalorder %s2834_s23, 0  ;;  %s343_s15 = scalar_lea.vmem [#allocation9], %s2469_s13 }
  0xbf   : > { %s350_s3 = sshll.u32 %s343_s15, 4  ;;  %s2132_s10 = scalar_lea.hbm %s2572_s29, 128  ;;  %s351_s3 = int_to_ptr.vmem [resolvable:$true] %s350_s3 }
  0xc0   : > { %1860 = dma.hbm_to_vmem [thread:$0]  (!%p2843_p6), %s2563_s5, 128, %s2566_s9, %s303_s1  }
  0xc1   : > { %p2133_p8 = scmp.ne.s32.totalorder %s2572_s29, %s2132_s10  ;;  %s2137_s22 = scalar_lea.hbm %s2785_s2, 256 }
  0xc2   : > { %p2138_p11 = scmp.lt.u32.totalorder %s2572_s29, %s2785_s2  ;;  %p2139_p7 = scmp.lt.u32.totalorder %s2137_s22, %s2132_s10 }
  0xc3   : > { %p2135_p9 = pnand %p2133_p8, %p2842_p3  ;;  %p2141_p4 = scmp.lt.u32.totalorder %s2132_s10, %s2572_s29 }
  0xc4   : > { %p2140_p0 = por %p2139_p7, %p2138_p11 }
  0xc5   : > { %p2136_p5 = pneg %p2135_p9 }
  0xc6   : > { %p2142_p10 = por %p2141_p4, %p2140_p0 }
  0xc8   : > { %p2143_p13 = pnand %p2142_p10, %p2136_p5 }
  0xca   : > { %2146 = shalt.err (!%p2143_p13)
}
  0xcb   : > { %s2147_s13 = scalar_lea.vmem %s351_s3, 128  ;;  %s2266_s5 = smov [#allocation9]  }
  0xcc   : > { %p2148_p2 = scmp.ne.s32.totalorder %s351_s3, %s2147_s13  ;;  %s2152_s9 = sshll.u32 %s2266_s5, 4  ;;  %s2153_s9 = int_to_ptr.vmem [resolvable:$false] %s2152_s9 }
  0xcd   : > { %s2154_s1 = scalar_lea.vmem %s2153_s9, 256  ;;  %p2155_p8 = scmp.lt.s32.totalorder %s351_s3, %s2153_s9 }
  0xce   : > { %p2150_p1 = pnand %p2148_p2, %p2842_p3  ;;  %p2156_p9 = scmp.lt.s32.totalorder %s2154_s1, %s2147_s13 }
  0xd0   : > { %p2151_p12 = pneg %p2150_p1  ;;  %p2157_p6 = por %p2156_p9, %p2155_p8 }
  0xd2   : > { %p2158_p7 = pnand %p2157_p6, %p2151_p12 }
  0xd4   : > { %2161 = shalt.err (!%p2158_p7)
}
  0xd5   : > { %p2844_p11 = scmp.ne.s32.totalorder %s2834_s23, 0  ;;  %p2845_p5 = scmp.ne.s32.totalorder %s2822_s8, 0 }
  0xd6   : > { %s2619_s28 = sand.u32 (!%p2845_p5), 1, %s2240_s25   ;;  %p2846_p3 = scmp.ne.s32.totalorder (!%p2845_p5), %s2829_s20, 0 }
  0xd7   : > { %1866 = dma.hbm_to_vmem [thread:$0]  (!%p2844_p11), %s2572_s29, 128, %s351_s3, %s2487_s18  }
  0xd8   : > { %359 = sbr.rel (%p2845_p5) target bundleno = 1520 (0x5f0), region = 48  ;;  %s2622_s14 = sshll.u32 (!%p2845_p5), %s2619_s28, 3 }
  0xd9   : > { %s362_s16 = scalar_lea.sflag (!%p2845_p5), [#allocation5], %s2619_s28  ;;  %s365_s11 = scalar_lea.vmem (!%p2845_p5), [#allocation4], %s2622_s14 }
  0xdf   : > { %2215 = dma.done.wait (%p2846_p3), %s362_s16, 128  }
  0xe0   : > { %2217 = vsyncadd (%p2846_p3), %s362_s16, 4294967168  ;;  %s370_s8 = sand.u32 1, %s2348_s30   ;;  %s374_s18 = scalar_lea.vmem [#allocation7], %s2622_s14 }
  0xe1   : > { %s371_s23 = scalar_lea.sflag [#allocation8], %s370_s8 }
  0xe2   : > { %2219 = dma.done.wait (%p2846_p3), %s371_s23, 256  }
  0xe3   : > { %2221 = vsyncadd (%p2846_p3), %s371_s23, 4294967040  ;;  %s383_s29 = scalar_lea.vmem [#allocation9], %s2622_s14  ;;  %p2847_p6 = scmp.eq.s32.totalorder %s2348_s30, 0 }
  0xe5   : > { %2223 = dma.done.wait (%p2847_p6), [#allocation11], 1024   ;;  %p2848_p0 = pmov %p2847_p6 }
  0xe7   : > { %2225 = vsyncadd (%p2848_p0), [#allocation11], 4294966272  ;;  %p2849_p4 = pmov %p2848_p0 }
  0xe8   : > { %p2850_p10 = pmov %p2848_p0 }
  0xe9   : > { %2227 = dma.done.wait (%p2849_p4), [#allocation14], 1024  }
  0xea   : > { %2229 = vsyncadd (%p2850_p10), [#allocation14], 4294966272  ;;  %v2267_v0 = vmov 0.0|0.0   ;;  %vm2268_vm0 = vmmov 0   ;;  %v2269_v1 = vmov 0.0   ;;  %v446_v2 = vld [vmem:[#allocation12] sm:$0xff] }
  0xeb   : > { %1796 = vmatprep.subr.bf16.mxu0 %v2267_v0  ;;  %1720 = vmatprep.mubr.msk.f32.mxu0 %vm2268_vm0, %v2269_v1  ;;  %v447_v3 = vld [vmem:[#allocation12 + $0x8] sm:$0xff]  ;;  %v448_v4 = vld [vmem:[#allocation12 + $0x10] sm:$0xff]  ;;  %v449_v6 = vld [vmem:[#allocation12 + $0x18] sm:$0xff]  ;;  %vm450_vm1 = vcmask 261120   ;;  %vm611_vm2 = vcmask 64512   ;;  %s2270_s30 = smov 104  }
  0xec   : > { %1802 = vmatprep.subr.bf16.mxu1 %v2267_v0  ;;  %1731 = vmatprep.mubr.msk.f32.mxu1 %vm2268_vm0, %v2269_v1  ;;  %v1797_v5 = vpack.c.bf16 %v447_v3, %v446_v2  ;;  %v1800_v7 = vpack.c.bf16 %v449_v6, %v448_v4  ;;  %v524_v8 = vld [vmem:[#allocation13] sm:$0xff]  ;;  %v525_v9 = vld [vmem:[#allocation13 + $0x8] sm:$0xff]  ;;  %v633_v15 = vld [vmem:[#allocation10 + $0x10] sm:$0xff]  ;;  %s2271_s20 = smov 120   ;;  %s2272_s17 = smov 112   ;;  %vm1375_vm3 = vcmask 130048  }
  0xed   : > { %v631_v10 = vld [vmem:[#allocation10] sm:$0xff]  ;;  %v632_v11 = vld [vmem:[#allocation10 + $0x8] sm:$0xff]  ;;  %v1803_v12 = vpack.c.bf16 %v525_v9, %v524_v8  ;;  %v634_v16 = vld [vmem:[#allocation10 + $0x18] sm:$0xff]  ;;  %s2273_s15 = smov 8   ;;  %s2274_s3 = smov 16   ;;  %vm1377_vm4 = vcmask 195584  }
  0xee   : > { %1798 = vmatpush3.bf16.msra.mxu0 %v1797_v5  ;;  %v444_v13 = vld [vmem:[%s374_s18] sm:$0xff]  ;;  %v1809_v14 = vpack.c.bf16 %v632_v11, %v631_v10  ;;  %v1812_v17 = vpack.c.bf16 %v634_v16, %v633_v15  ;;  %v630_v18 = vld [vmem:[%s365_s11] sm:$0xff]  ;;  %s2275_s10 = smov 24   ;;  %s1673_s12 = sshll.u32 %s2248_s27, 7 }
  0xef   : > { %1799 = vmatprep.subr.bf16.mxu0 %v2267_v0  ;;  %1804 = vmatpush3.bf16.msra.mxu1 %v1803_v12  ;;  %v526_v19 = vld [vmem:[#allocation13 + $0x10] sm:$0xff]  ;;  %v527_v20 = vld [vmem:[#allocation13 + $0x18] sm:$0xff]  ;;  %s439_s7 = scalar_lea.vmem [#allocation16], %s2622_s14  ;;  %s2851_s13 = sld [smem:[#allocation31_spill]] }
  0xf0   : > { %1805 = vmatprep.subr.bf16.mxu1 %v2267_v0  ;;  %v1806_v21 = vpack.c.bf16 %v527_v20, %v526_v19  ;;  %v445_v22 = vld [vmem:[%s383_s29] sm:$0xff]  ;;  %v1379_v20 = vld [vmem:[#allocation15] sm:$0xff]  ;;  %s1472_s22 = sshll.u32 %s439_s7, 4  ;;  %s1458_s9 = scalar_lea.sflag [#allocation6], %s2619_s28  ;;  %s2735_s22 = int_to_ptr.vmem [resolvable:$true] %s1472_s22 }
  0xf1   : > { %s2162_s1 = scalar_lea.vmem %s2735_s22, 128  ;;  %p2852_p2 = scmp.ne.s32.totalorder %s2830_s21, 0 }
  0xf2   : > { %1801 = vmatpush3.bf16.msra.mxu0 %v1800_v7  ;;  %p2163_p13 = scmp.ne.s32.totalorder %s2735_s22, %s2162_s1  ;;  %s2276_s27 = smov [#allocation16]  }
  0xf3   : > { %1808 = vmatprep.subr.bf16.mxu0 %v2267_v0  ;;  %1807 = vmatpush3.bf16.msra.mxu1 %v1806_v21  ;;  %v1380_v21 = vld [vmem:[#allocation15 + $0x8] sm:$0xff]  ;;  %s2166_s14 = sshll.u32 %s2276_s27, 4  ;;  %s2167_s14 = int_to_ptr.vmem [resolvable:$false] %s2166_s14 }
  0xf4   : > { %1745 = vmatprep.subr.mxu1 %v2269_v1  ;;  %p2164_p1 = pnand %p2163_p13, %p2852_p2  ;;  %s2168_s16 = scalar_lea.vmem %s2167_s14, 256 }
  0xf5   : > { %1721 = vmatmul.mubr.msk.f32.vlgmr.msra.gmra.mrb[0].mxu0 %vm450_vm1, %v444_v13  ;;  %s2733_s5 = scalar_lea.hbm %s2851_s13, %s1673_s12  ;;  %p2169_p8 = scmp.lt.s32.totalorder %s2735_s22, %s2167_s14 }
  0xf6   : > { %1810 = vmatpush3.bf16.msra.mxu0 %v1809_v14  ;;  %1742 = vmatprep.mubr.msk.f32.mxu0 %vm2268_vm0, %v2269_v1  ;;  %p2165_p12 = pneg %p2164_p1  ;;  %p2170_p9 = scmp.lt.s32.totalorder %s2168_s16, %s2162_s1 }
  0xf7   : > { %1811 = vmatprep.subr.bf16.mxu0 %v2267_v0  ;;  %1732 = vmatmul.mubr.msk.f32.vlgmr.msra.gmra.mrb[0].mxu1 %vm450_vm1, %v445_v22  ;;  %v1815_v22 = vpack.c.bf16 %v1380_v21, %v1379_v20 }
  0xf8   : > { %1747 = vmatprep.mubr.msk.f32.mxu1 %vm2268_vm0, %v2269_v1  ;;  %p2171_p7 = por %p2170_p9, %p2169_p8 }
  0xfa   : > { %1813 = vmatpush3.bf16.msra.mxu0 %v1812_v17  ;;  %p2172_p11 = pnand %p2171_p7, %p2165_p12 }
  0xfb   : > { %1765 = vmatprep.subr.mxu0 %v2269_v1 }
  0xfd   : > { %1743 = vmatmul.mubr.msk.f32.vlgmr.msra.gmra.mrb[2].mxu0 %vm450_vm1, %v630_v18 }
  0xfe   : > { %1767 = vmatprep.mubr.msk.f32.mxu0 %vm2268_vm0, %v2269_v1 }
 0x1c8   : > { %v520_v23 = vpop.f32.mrb[0].mxu0 }
 0x1c9   : > { %612 = vst.msk [vmem:[#allocation2] sm:$0xff] %vm611_vm2, %v520_v23  ;;  %608 = vrot.lane.b32.xlu1 %v520_v23, %s2270_s30  ;;  %602 = vrot.lane.b32.xlu0 %v520_v23, %s2271_s20  ;;  %v1722_v24 = vpop.f32.mrb[1].mxu0 }
 0x1ca   : > { %v597_v29 = vpop.f32.mrb[0].mxu1  ;;  %v1381_v24 = vld [vmem:[#allocation15 + $0x10] sm:$0xff] }
 0x1cb   : > { %626 = vst.msk [vmem:[#allocation3] sm:$0xff] %vm611_vm2, %v597_v29  ;;  %v1733_v30 = vpop.f32.mrb[1].mxu1 }
 0x1cd   : > { %605 = vrot.lane.b32.xlu0 %v520_v23, %s2272_s17 }
 0x1d0   : > { %v705_v25 = vpop.f32.mrb[2].mxu0  ;;  %v717_v26 = vld [vmem:[#allocation2] sm:$0xff] }
 0x1d1   : > { %v709_v27 = vmul.f32 0.35355338, %v705_v25  ;;  %v1744_v28 = vpop.f32.mrb[3].mxu0  ;;  %1746 = vmatpush3.xpose.msk.msra.mxu1 %vm611_vm2, %v717_v26  ;;  %v1382_v25 = vld [vmem:[#allocation15 + $0x18] sm:$0xff] }
 0x1d2   : > { %1750 = vmatprep.subr.mxu1 %v2269_v1  ;;  %v1058_v31 = vld [vmem:[#allocation3] sm:$0xff]  ;;  %v1818_v26 = vpack.c.bf16 %v1382_v25, %v1381_v24 }
 0x1d3   : > { %711 = vrot.lane.b32.xlu1 %v709_v27, %s2271_s20  ;;  %713 = vrot.lane.b32.xlu0 %v709_v27, %s2272_s17 }
 0x1d4   : > { %1748 = vmatmul.mubr.msk.f32.vlgmr.msra.gmra.mrb[2].mxu1 %vm611_vm2, %v709_v27  ;;  %1766 = vmatpush3.msra.mxu0 %v1058_v31 }
 0x1d5   : > { %1752 = vmatprep.mubr.msk.f32.mxu1 %vm2268_vm0, %v2269_v1  ;;  %1775 = vmatprep.subr.mxu0 %v2269_v1 }
 0x1d7   : > { %715 = vrot.lane.b32.xlu1 %v709_v27, %s2270_s30 }
 0x1db   : > { %617 = vrot.lane.b32.xlu1 %v597_v29, %s2271_s20 }
 0x23b   : > { %v609_v32 = vpop.permute.xlu1 %608  ;;  %v603_v33 = vpop.permute.xlu0 %602 }
 0x23c   : > { %615 = vst.msk [vmem:[#allocation2 + $0x18] sm:$0xff] %vm611_vm2, %v609_v32  ;;  %613 = vst.msk [vmem:[#allocation2 + $0x8] sm:$0xff] %vm611_vm2, %v603_v33 }
 0x23f   : > { %v606_v34 = vpop.permute.xlu0 %605 }
 0x240   : > { %614 = vst.msk [vmem:[#allocation2 + $0x10] sm:$0xff] %vm611_vm2, %v606_v34 }
 0x243   : > { %v718_v35 = vld [vmem:[#allocation2 + $0x8] sm:$0xff]  ;;  %v720_v39 = vld [vmem:[#allocation2 + $0x18] sm:$0xff] }
 0x244   : > { %1751 = vmatpush3.xpose.msk.msra.mxu1 %vm611_vm2, %v718_v35 }
 0x245   : > { %v712_v36 = vpop.permute.xlu1 %711  ;;  %1755 = vmatprep.subr.mxu1 %v2269_v1  ;;  %v714_v38 = vpop.permute.xlu0 %713 }
 0x247   : > { %1753 = vmatmul.mubr.msk.f32.vlgmr.msra.gmra.mrb[4].mxu1 %vm611_vm2, %v712_v36  ;;  %v719_v37 = vld [vmem:[#allocation2 + $0x10] sm:$0xff] }
 0x248   : > { %1756 = vmatpush3.xpose.msk.msra.mxu1 %vm611_vm2, %v719_v37  ;;  %1757 = vmatprep.mubr.msk.f32.mxu1 %vm2268_vm0, %v2269_v1 }
 0x249   : > { %1760 = vmatprep.subr.mxu1 %v2269_v1  ;;  %v716_v40 = vpop.permute.xlu1 %715 }
 0x24b   : > { %1758 = vmatmul.mubr.msk.f32.vlgmr.msra.gmra.mrb[6].mxu1 %vm611_vm2, %v714_v38 }
 0x24c   : > { %1761 = vmatpush3.xpose.msk.msra.mxu1 %vm611_vm2, %v720_v39  ;;  %1762 = vmatprep.mubr.msk.f32.mxu1 %vm2268_vm0, %v2269_v1 }
 0x24d   : > { %1770 = vmatprep.subr.mxu1 %v2269_v1  ;;  %v618_v44 = vpop.permute.xlu1 %617 }
 0x24e   : > { %627 = vst.msk [vmem:[#allocation3 + $0x8] sm:$0xff] %vm611_vm2, %v618_v44 }
 0x24f   : > { %1763 = vmatmul.mubr.msk.f32.vlgmr.msra.gmra.mrb[8].mxu1 %vm611_vm2, %v716_v40 }
 0x250   : > { %1772 = vmatprep.mubr.msk.f32.mxu1 %vm2268_vm0, %v2269_v1 }
 0x255   : > { %v1059_v45 = vld [vmem:[#allocation3 + $0x8] sm:$0xff] }
 0x256   : > { %1771 = vmatpush3.msra.mxu1 %v1059_v45 }
 0x257   : > { %1780 = vmatprep.subr.mxu1 %v2269_v1 }
 0x2a7   : > { %v793_v41 = vpop.f32.mrb[2].mxu1 }
 0x2a8   : > { %v1749_v42 = vpop.f32.mrb[3].mxu1  ;;  %v1022_v43 = vsel %vm611_vm2, %v793_v41, -inf }
 0x2a9   : > { %1023 = vmax.xlane.f32.xlu0 %v1022_v43 }
 0x31a   : > { %v868_v46 = vpop.f32.mrb[4].mxu1 }
 0x31b   : > { %v1754_v47 = vpop.f32.mrb[5].mxu1  ;;  %v1025_v48 = vsel %vm611_vm2, %v868_v46, -inf }
 0x31c   : > { %1026 = vmax.xlane.f32.xlu1 %v1025_v48 }
 0x31e   : > { %v943_v49 = vpop.f32.mrb[6].mxu1 }
 0x31f   : > { %v1759_v50 = vpop.f32.mrb[7].mxu1  ;;  %v1028_v51 = vsel %vm611_vm2, %v943_v49, -inf }
 0x320   : > { %1029 = vmax.xlane.f32.xlu0 %v1028_v51 }
 0x322   : > { %v1018_v52 = vpop.f32.mrb[8].mxu1 }
 0x323   : > { %v1764_v53 = vpop.f32.mrb[9].mxu1  ;;  %v1031_v54 = vsel %vm611_vm2, %v1018_v52, -inf }
 0x324   : > { %1032 = vmax.xlane.f32.xlu0 %v1031_v54 }
 0x32d   : > { %623 = vrot.lane.b32.xlu1 %v597_v29, %s2270_s30 }
 0x336   : > { %v1024_v55 = vpop.xlane.xlu0 %1023 }
 0x337   : > { %v1034_v56 = vsub.f32 %v793_v41, %v1024_v55 }
 0x339   : > { %v1038_v57 = vmul.f32 1.442695, %v1034_v56 }
 0x33a   : > { %620 = vrot.lane.b32.xlu0 %v597_v29, %s2272_s17 }
 0x33b   : > { %1944 = vpow2.f32 %v1038_v57 }
 0x345   : > { %v1945_v58 = vpop.eup %1944 }
 0x346   : > { %1768 = vmatmul.mubr.msk.f32.vlgmr.msra.gmra.mrb[4].mxu0 %vm611_vm2, %v1945_v58  ;;  %v1046_v12 = vsel %vm611_vm2, %v1945_v58, 0.0 }
 0x347   : > { %1777 = vmatprep.mubr.msk.f32.mxu0 %vm2268_vm0, %v2269_v1 }
 0x3a9   : > { %v1027_v59 = vpop.xlane.xlu1 %1026 }
 0x3aa   : > { %v1035_v60 = vsub.f32 %v868_v46, %v1027_v59 }
 0x3ac   : > { %v1040_v61 = vmul.f32 1.442695, %v1035_v60 }
 0x3ad   : > { %v624_v62 = vpop.permute.xlu1 %623  ;;  %v1030_v63 = vpop.xlane.xlu0 %1029 }
 0x3ae   : > { %1946 = vpow2.f32 %v1040_v61  ;;  %629 = vst.msk [vmem:[#allocation3 + $0x18] sm:$0xff] %vm611_vm2, %v624_v62  ;;  %v1036_v2 = vsub.f32 %v943_v49, %v1030_v63 }
 0x3b0   : > { %v1042_v3 = vmul.f32 1.442695, %v1036_v2 }
 0x3b1   : > { %v1033_v4 = vpop.xlane.xlu0 %1032 }
 0x3b2   : > { %1948 = vpow2.f32 %v1042_v3  ;;  %v1037_v5 = vsub.f32 %v1018_v52, %v1033_v4 }
 0x3b4   : > { %v1044_v6 = vmul.f32 1.442695, %v1037_v5 }
 0x3b5   : > { %v621_v7 = vpop.permute.xlu0 %620  ;;  %v1061_v9 = vld [vmem:[#allocation3 + $0x18] sm:$0xff] }
 0x3b6   : > { %1950 = vpow2.f32 %v1044_v6  ;;  %628 = vst.msk [vmem:[#allocation3 + $0x10] sm:$0xff] %vm611_vm2, %v621_v7 }
 0x3b8   : > { %v1947_v8 = vpop.eup %1946 }
 0x3b9   : > { %1773 = vmatmul.mubr.msk.f32.vlgmr.msra.gmra.mrb[10].mxu1 %vm611_vm2, %v1947_v8  ;;  %v1049_v10 = vsel %vm611_vm2, %v1947_v8, 0.0 }
 0x3ba   : > { %1781 = vmatpush3.msra.mxu1 %v1061_v9  ;;  %1050 = vadd.xlane.f32.xlu1 %v1049_v10 }
 0x3bb   : > { %1782 = vmatprep.mubr.msk.f32.mxu1 %vm2268_vm0, %v2269_v1 }
 0x3bc   : > { %v1949_v11 = vpop.eup %1948 }
 0x3bd   : > { %v1052_v13 = vsel %vm611_vm2, %v1949_v11, 0.0  ;;  %v1060_v14 = vld [vmem:[#allocation3 + $0x10] sm:$0xff] }
 0x3be   : > { %1047 = vadd.xlane.f32.xlu1 %v1046_v12  ;;  %1053 = vadd.xlane.f32.xlu0 %v1052_v13 }
 0x3bf   : > { %1776 = vmatpush3.msra.mxu0 %v1060_v14 }
 0x3c0   : > { %v1951_v15 = vpop.eup %1950  ;;  %1778 = vmatmul.mubr.msk.f32.vlgmr.msra.gmra.mrb[6].mxu0 %vm611_vm2, %v1949_v11  ;;  %1814 = vmatprep.subr.bf16.mxu0 %v2267_v0 }
 0x3c1   : > { %1783 = vmatmul.mubr.msk.f32.vlgmr.msra.gmra.mrb[12].mxu1 %vm611_vm2, %v1951_v15  ;;  %v1055_v16 = vsel %vm611_vm2, %v1951_v15, 0.0  ;;  %1793 = vmatprep.mubr.msk.f32.mxu0 %vm2268_vm0, %v2269_v1 }
 0x3c2   : > { %1056 = vadd.xlane.f32.xlu0 %v1055_v16  ;;  %1816 = vmatpush3.bf16.msra.mxu0 %v1815_v22 }
 0x3c3   : > { %1817 = vmatprep.subr.bf16.mxu0 %v2267_v0 }
 0x3c6   : > { %1819 = vmatpush3.bf16.msra.mxu0 %v1818_v26 }
 0x419   : > { %v1131_v17 = vpop.f32.mrb[4].mxu0 }
 0x41a   : > { %v1769_v18 = vpop.f32.mrb[5].mxu0 }
 0x447   : > { %v1051_v19 = vpop.xlane.xlu1 %1050 }
 0x448   : > { %1952 = vrcp.f32 %v1051_v19 }
 0x44b   : > { %v1054_v23 = vpop.xlane.xlu0 %1053  ;;  %v1048_v38 = vpop.xlane.xlu1 %1047 }
 0x44c   : > { %1954 = vrcp.f32 %v1054_v23 }
 0x44f   : > { %v1057_v27 = vpop.xlane.xlu0 %1056 }
 0x450   : > { %1956 = vrcp.f32 %v1057_v27 }
 0x451   : > { %1958 = vrcp.f32 %v1048_v38 }
 0x452   : > { %v1953_v28 = vpop.eup %1952 }
 0x456   : > { %v1955_v31 = vpop.eup %1954 }
 0x45a   : > { %v1957_v0 = vpop.eup %1956 }
 0x45b   : > { %v1959_v39 = vpop.eup %1958 }
 0x45c   : > { %v1358_v42 = vmul.f32 %v1959_v39, %v1131_v17 }
 0x48c   : > { %v1204_v1 = vpop.f32.mrb[10].mxu1 }
 0x48d   : > { %v1359_v29 = vmul.f32 %v1953_v28, %v1204_v1  ;;  %v1774_v30 = vpop.f32.mrb[11].mxu1 }
 0x48f   : > { %1363 = vrot.lane.b32.xlu0 %v1359_v29, %s2273_s15 }
 0x493   : > { %v1277_v32 = vpop.f32.mrb[6].mxu0 }
 0x494   : > { %v1360_v33 = vmul.f32 %v1955_v31, %v1277_v32  ;;  %v1779_v34 = vpop.f32.mrb[7].mxu0  ;;  %v1350_v35 = vpop.f32.mrb[12].mxu1 }
 0x495   : > { %v1784_v36 = vpop.f32.mrb[13].mxu1  ;;  %v1361_v37 = vmul.f32 %v1957_v0, %v1350_v35 }
 0x496   : > { %1367 = vrot.lane.b32.xlu1 %v1360_v33, %s2274_s3 }
 0x49a   : > { %1371 = vrot.lane.b32.xlu1 %v1361_v37, %s2275_s10 }
 0x501   : > { %v1364_v40 = vpop.permute.xlu0 %1363 }
 0x502   : > { %v1374_v43 = vsel %vm611_vm2, %v1358_v42, %v1364_v40 }
 0x508   : > { %v1368_v41 = vpop.permute.xlu1 %1367 }
 0x509   : > { %v1376_v44 = vsel %vm1375_vm3, %v1374_v43, %v1368_v41 }
 0x50c   : > { %v1372_v45 = vpop.permute.xlu1 %1371 }
 0x50d   : > { %v1378_v46 = vsel %vm1377_vm4, %v1376_v44, %v1372_v45 }
 0x50e   : > { %1794 = vmatmul.mubr.msk.f32.vlgmr.msra.gmra.mrb[8].mxu0 %vm450_vm1, %v1378_v46 }
 0x5e1   : > { %v1452_v47 = vpop.f32.mrb[8].mxu0 }
 0x5e2   : > { %1456 = vst.msk [vmem:[%s439_s7] sm:$0xff] %vm450_vm1, %v1452_v47  ;;  %v1795_v48 = vpop.f32.mrb[9].mxu0 }
 0x5e3   : > { %2175 = shalt.err (!%p2172_p11)
}
 0x5e4   : > { %s2176_s28 = scalar_lea.hbm %s2733_s5, 128  ;;  %s2180_s23 = scalar_lea.hbm %s2851_s13, 256 }
 0x5e5   : > { %p2177_p5 = scmp.ne.s32.totalorder %s2733_s5, %s2176_s28  ;;  %p2181_p0 = scmp.lt.u32.totalorder %s2733_s5, %s2851_s13 }
 0x5e6   : > { %p2182_p4 = scmp.lt.u32.totalorder %s2180_s23, %s2176_s28  ;;  %p2184_p13 = scmp.lt.u32.totalorder %s2176_s28, %s2733_s5 }
 0x5e7   : > { %p2178_p3 = pnand %p2177_p5, %p2852_p2 }
 0x5e8   : > { %p2183_p10 = por %p2182_p4, %p2181_p0 }
 0x5e9   : > { %p2179_p6 = pneg %p2178_p3 }
 0x5ea   : > { %p2185_p1 = por %p2184_p13, %p2183_p10 }
 0x5ec   : > { %p2186_p12 = pnand %p2185_p1, %p2179_p6 }
 0x5ee   : > { %2189 = shalt.err (!%p2186_p12)
}
 0x5ef   : > { %1842 = dma.vmem_to_hbm [thread:$0]  (%p2852_p2), %s2735_s22, 128, %s2733_s5, %s1458_s9  }
 0x5f0 PF: > { %s2853_s30 = sld [smem:[#allocation22_spill]]  ;;  %s2854_s20 = sld [smem:[#allocation27_spill]] }
 0x5f1   : > { %s2855_s17 = sld [smem:[#allocation24_spill]] }
 0x5f6   : > { %s1484_s15 = sand.u32 1, %s2853_s30   ;;  %p2856_p8 = scmp.ne.s32.totalorder %s2854_s20, 0 }
 0x5f7   : > { %p2857_p9 = scmp.ge.s32.totalorder %s2855_s17, 2  ;;  %s1485_s3 = scalar_lea.sflag [#allocation6], %s1484_s15 }
 0x5f9   : > { %p1868_p7 = pnand %p2857_p9, %p2856_p8 }
 0x5fb   : > { %2231 = dma.done.wait (!%p1868_p7), %s1485_s3, 128  }
 0x5fc   : > { %2233 = vsyncadd (!%p1868_p7), %s1485_s3, 4294967168  ;;  %s28_s29 = sadd.s32 1, %s2855_s17   ;;  %s2858_s21 = sld [smem:[#allocation26_spill]] }
 0x5fd   : > { %p25_p11 = scmp.ge.s32.totalorder %s28_s29, 4   ;;  %s2859_s27 = sld [smem:[#allocation23_spill]] }
 0x5fe   : > { %s2860_s28 = sld [smem:[#allocation25_spill]]  ;;  %s2861_s24 = smov %s2240_s25 }
 0x5ff   : > { %s2862_s25 = smov %s2244_s26  ;;  %27 = sbr.rel (!%p25_p11) target bundleno = 15 (0xf), region = 137 }
 0x602   : > { %s2863_s26 = smov %s2858_s21 }
 0x606   :  { %1490 = vsyncpa [#allocation5], 1 }
 0x607   :  { %1492 = vsyncpa [#allocation5 + $0x1], 1 }
 0x608   :  { %1493 = vsyncpa [#allocation8], 1 }
 0x609   :  { %1495 = vsyncpa [#allocation8 + $0x1], 1 }
 0x60a   :  { %1496 = vsyncpa [#allocation11], 1 }
 0x60b   :  { %1497 = vsyncpa [#allocation14], 1 }
 0x60c   :  { %1498 = vsyncpa [#allocation6], 1 }
 0x60d   :  { %1500 = vsyncpa [#allocation6 + $0x1], 1 }

</bundles_post_ra>
